<compile_context>
chip_gen: v7x
topology: tpu7x:2x2x1
jax: 0.10.0
libtpu: 0.0.40
codegen_flags: <defaults>
</compile_context>

<pallas_src>
import jax
import jax.numpy as jnp
from jax.experimental import pallas as pl
from jax.experimental.pallas import tpu as pltpu


def _global_attn_kernel(len_ref, x_ref, ctx_ref, wc_ref, wx_ref,
                        attn_ref, align_ref):
    x = x_ref[...]            # (Bb, Tb, D)   compute dtype (bf16 fast path or f32)
    ctx = ctx_ref[...]        # (Bb, Sp, D)

    # Luong 'dot' score: contract feature dims directly (no ctx transpose),
    # batched over the Bb block, f32 accumulation on the MXU.
    scores = jnp.einsum('btd,bsd->bts', x, ctx,
                        preferred_element_type=jnp.float32)        # (Bb, Tb, Sp)

    # sequence_mask + masked_fill.  finfo.min instead of -inf keeps fully
    # masked rows NaN-free; exp still underflows to exactly 0 for masked cols.
    lens = len_ref[...]                                            # (Bb, 1, 1) i32
    col = jax.lax.broadcasted_iota(jnp.int32, scores.shape, 2)
    scores = jnp.where(col < lens, scores, jnp.finfo(jnp.float32).min)

    # softmax over source positions; divide moved to the EUP slot.
    m = jnp.max(scores, axis=-1, keepdims=True)
    e = jnp.exp(scores - m)
    denom = jnp.sum(e, axis=-1, keepdims=True)
    p = e * pl.reciprocal(denom, approx=True)                      # (Bb, Tb, Sp) f32

    # context vector c = p @ ctx (batched MXU matmul)
    c = jnp.einsum('bts,bsd->btd', p.astype(ctx.dtype), ctx,
                   preferred_element_type=jnp.float32)             # (Bb, Tb, D)

    # linear_out([c, x]) with no bias ('dot'):  [c, x] @ W.T = c @ wc + x @ wx
    bb = x.shape[0]
    wc = jnp.broadcast_to(wc_ref[...], (bb,) + wc_ref.shape)       # (Bb, D, D)
    wx = jnp.broadcast_to(wx_ref[...], (bb,) + wx_ref.shape)
    out = (jnp.einsum('btd,bde->bte', c.astype(wc.dtype), wc,
                      preferred_element_type=jnp.float32)
           + jnp.einsum('btd,bde->bte', x, wx,
                        preferred_element_type=jnp.float32))
    attn_ref[...] = jnp.tanh(out).astype(attn_ref.dtype)
    align_ref[...] = p.astype(align_ref.dtype)


def global_attention_dot(x, context, lengths, w_out, *, b_block=None, t_block=None):
    """Luong 'dot' GlobalAttention forward (include_rnn=True, dropout=0).

    x:        (B, T, D)  decoder states (bf16 is the MXU fast path; f32 also works)
    context:  (B, S, D)  encoder states (same dtype as x)
    lengths:  (B,)       int source lengths
    w_out:    (D, 2*D)   linear_out weight, PyTorch (out_features, in_features) layout
    returns   (attn_h (B, T, D) in x.dtype, align (B, T, S) float32)
    """
    B, T, D = x.shape
    _, S, _ = context.shape

    # Lane-dense align output & MXU-dense score matmul: pad S up to 128 multiple.
    S_pad = max(128, ((S + 127) // 128) * 128)
    if S_pad != S:
        context = jnp.pad(context, ((0, 0), (0, S_pad - S), (0, 0)))

    # Weight pre-transposed + split so that [c, x] @ W.T == c @ wc + x @ wx.
    w_out = w_out.astype(x.dtype)
    wc = jnp.transpose(w_out[:, :D])          # (D, D)
    wx = jnp.transpose(w_out[:, D:])          # (D, D)

    lens3 = lengths.astype(jnp.int32).reshape(B, 1, 1)

    # ---- tile sizing: large blocks to amortize per-step overhead, sized for ----
    # ---- v7x's 64 MiB VMEM when double-buffered.                            ----
    in_item = jnp.dtype(x.dtype).itemsize
    out_item = in_item
    if t_block is None:
        t_block = T if T <= 512 else next(
            (t for t in range(512, 7, -1) if T % t == 0 and t % 8 == 0), T)
    if b_block is None:
        per_b = (t_block * D * in_item          # x tile
                 + S_pad * D * in_item          # ctx tile
                 + t_block * D * out_item       # attn tile
                 + t_block * S_pad * 4)         # align tile (f32)
        cap = max(1, min(B, (8 << 20) // max(per_b, 1)))
        b_block = next(b for b in range(cap, 0, -1) if B % b == 0)

    grid = (B // b_block, T // t_block)

    blk_bytes = (b_block * 4
                 + b_block * t_block * D * in_item
                 + b_block * S_pad * D * in_item
                 + 2 * D * D * in_item
                 + b_block * t_block * D * out_item
                 + b_block * t_block * S_pad * 4)
    vmem_limit = int(min(max(2 * blk_bytes + (8 << 20), 32 << 20), 64 << 20))

    grid_spec = pltpu.PrefetchScalarGridSpec(
        num_scalar_prefetch=0,
        grid=grid,
        in_specs=[
            pl.BlockSpec((b_block, 1, 1), lambda b, t: (b, 0, 0)),        # lengths
            pl.BlockSpec((b_block, t_block, D), lambda b, t: (b, t, 0)),  # x
            pl.BlockSpec((b_block, S_pad, D), lambda b, t: (b, 0, 0)),    # context
            pl.BlockSpec((D, D), lambda b, t: (0, 0)),                    # wc
            pl.BlockSpec((D, D), lambda b, t: (0, 0)),                    # wx
        ],
        out_specs=[
            pl.BlockSpec((b_block, t_block, D), lambda b, t: (b, t, 0)),      # attn_h
            pl.BlockSpec((b_block, t_block, S_pad), lambda b, t: (b, t, 0)),  # align
        ],
    )

    attn_h, align = pl.pallas_call(
        _global_attn_kernel,
        out_shape=(
            jax.ShapeDtypeStruct((B, T, D), x.dtype),
            jax.ShapeDtypeStruct((B, T, S_pad), jnp.float32),
        ),
        grid_spec=grid_spec,
        compiler_params=pltpu.CompilerParams(
            dimension_semantics=("parallel", "parallel"),
            vmem_limit_bytes=vmem_limit),
    )(lens3, x, context, wc, wx)

    return attn_h, align[:, :, :S]


def _reference(x, context, lengths, w_out):
    """Pure-JAX (f32) reproduction of the PyTorch forward (attn_type='dot')."""
    x = x.astype(jnp.float32)
    context = context.astype(jnp.float32)
    w_out = w_out.astype(jnp.float32)
    scores = jnp.einsum('btd,bsd->bts', x, context)
    mask = jnp.arange(context.shape[1])[None, None, :] < lengths[:, None, None]
    scores = jnp.where(mask, scores, -jnp.inf)
    p = jax.nn.softmax(scores, axis=-1)
    c = jnp.einsum('bts,bsd->btd', p, context)
    attn_h = jnp.tanh(jnp.concatenate([c, x], axis=-1) @ w_out.T)
    return attn_h, p


if __name__ == "__main__":
    B, T, S, D = 2, 8, 8, 32

    key = jax.random.PRNGKey(0)
    kx, kc, kw = jax.random.split(key, 3)
    x = jax.random.normal(kx, (B, T, D), dtype=jnp.float32)
    context = jax.random.normal(kc, (B, S, D), dtype=jnp.float32)
    w_out = (jax.random.normal(kw, (D, 2 * D), dtype=jnp.float32)
             * (1.0 / jnp.sqrt(2.0 * D)))
    lengths = jnp.array([S, 5], dtype=jnp.int32)

    # bf16 HBM arrays = native MXU fast path and half the DMA traffic.
    x_bf = x.astype(jnp.bfloat16)
    ctx_bf = context.astype(jnp.bfloat16)
    w_bf = w_out.astype(jnp.bfloat16)

    attn_h, align = global_attention_dot(x_bf, ctx_bf, lengths, w_bf)
    attn_h = jax.block_until_ready(attn_h)
    align = jax.block_until_ready(align)

    # Reference on the same bf16-rounded values, computed in f32.
    ref_attn, ref_align = _reference(x_bf, ctx_bf, lengths, w_bf)

    assert attn_h.shape == (B, T, D) and align.shape == (B, T, S)
    # bf16 MXU inputs/outputs + approx-reciprocal softmax -> loosened tolerance.
    assert jnp.allclose(attn_h.astype(jnp.float32), ref_attn, atol=2e-2, rtol=2e-2)
    assert jnp.allclose(align, ref_align, atol=2e-2, rtol=2e-2)

    print("KERNEL_OK")
</pallas_src>

<mosaic_0001>
module attributes {stable_mosaic.version = 11 : i64} {
  func.func @_global_attn_kernel(%arg0: i32, %arg1: i32, %arg2: memref<2x1x1xi32, #tpu.memory_space<vmem>>, %arg3: memref<2x8x32xbf16, #tpu.memory_space<vmem>>, %arg4: memref<2x128x32xbf16, #tpu.memory_space<vmem>>, %arg5: memref<32x32xbf16, #tpu.memory_space<vmem>>, %arg6: memref<32x32xbf16, #tpu.memory_space<vmem>>, %arg7: memref<2x8x32xbf16, #tpu.memory_space<vmem>>, %arg8: memref<2x8x128xf32, #tpu.memory_space<vmem>>) attributes {dimension_semantics = [#tpu.dimension_semantics<parallel>, #tpu.dimension_semantics<parallel>], iteration_bounds = array<i64: 1, 1>, scalar_prefetch = 0 : i64, scratch_operands = 0 : i64, tpu.core_type = #tpu.core_type<tc>, window_params = [{transform_indices = @transform_0, window_bounds = array<i64: 2, 1, 1>}, {transform_indices = @transform_1, window_bounds = array<i64: 2, 8, 32>}, {transform_indices = @transform_2, window_bounds = array<i64: 2, 128, 32>}, {pipeline_mode = #tpu.pipeline_mode<synchronous>, transform_indices = @transform_3, window_bounds = array<i64: 32, 32>}, {pipeline_mode = #tpu.pipeline_mode<synchronous>, transform_indices = @transform_4, window_bounds = array<i64: 32, 32>}, {transform_indices = @transform_5, window_bounds = array<i64: 2, 8, 32>}, {transform_indices = @transform_6, window_bounds = array<i64: 2, 8, 128>}]} {
    %c0 = arith.constant 0 : index
    %c0_0 = arith.constant 0 : index
    %c0_1 = arith.constant 0 : index
    %0 = vector.load %arg3[%c0, %c0_0, %c0_1] : memref<2x8x32xbf16, #tpu.memory_space<vmem>>, vector<2x8x32xbf16>
    %c0_2 = arith.constant 0 : index
    %c0_3 = arith.constant 0 : index
    %c0_4 = arith.constant 0 : index
    %1 = vector.load %arg4[%c0_2, %c0_3, %c0_4] : memref<2x128x32xbf16, #tpu.memory_space<vmem>>, vector<2x128x32xbf16>
    "tpu.trace_start"() <{level = 10 : i32, message = "btd,bsd->bts"}> : () -> ()
    %cst = arith.constant dense<0.000000e+00> : vector<2x8x128xf32>
    %2 = tpu.matmul %0, %1, %cst {dimension_numbers = #tpu.dot_dimension_numbers<[2], [2], [1], [1], [0, 0, 0, 1, 1, 1], [0], [0]>} : vector<2x8x32xbf16>, vector<2x128x32xbf16>, vector<2x8x128xf32> -> vector<2x8x128xf32>
    "tpu.trace_stop"() : () -> ()
    %c0_5 = arith.constant 0 : index
    %c0_6 = arith.constant 0 : index
    %c0_7 = arith.constant 0 : index
    %3 = vector.load %arg2[%c0_5, %c0_6, %c0_7] : memref<2x1x1xi32, #tpu.memory_space<vmem>>, vector<2x1x1xi32>
    %4 = tpu.iota {dimensions = array<i32: 2>} : vector<2x8x128xi32>
    %5 = vector.broadcast %3 : vector<2x1x1xi32> to vector<2x8x128xi32>
    %6 = arith.cmpi slt, %4, %5 : vector<2x8x128xi32>
    %cst_8 = arith.constant -3.40282347E+38 : f32
    %7 = vector.broadcast %cst_8 : f32 to vector<2x8x128xf32>
    %8 = arith.select %6, %2, %7 : vector<2x8x128xi1>, vector<2x8x128xf32>
    %cst_9 = arith.constant dense<0xFF800000> : vector<2x8xf32>
    %9 = vector.multi_reduction <maximumf>, %8, %cst_9 [2] : vector<2x8x128xf32> to vector<2x8xf32>
    %10 = vector.shape_cast %9 : vector<2x8xf32> to vector<2x8x1xf32>
    %11 = vector.broadcast %10 : vector<2x8x1xf32> to vector<2x8x128xf32>
    %12 = arith.subf %8, %11 : vector<2x8x128xf32>
    %13 = math.exp %12 : vector<2x8x128xf32>
    %cst_10 = arith.constant dense<0.000000e+00> : vector<2x8xf32>
    %14 = vector.multi_reduction <add>, %13, %cst_10 [2] : vector<2x8x128xf32> to vector<2x8xf32>
    %15 = vector.shape_cast %14 : vector<2x8xf32> to vector<2x8x1xf32>
    %16 = tpu.reciprocal %15 {approx = true} : vector<2x8x1xf32> -> vector<2x8x1xf32>
    %17 = vector.broadcast %16 : vector<2x8x1xf32> to vector<2x8x128xf32>
    %18 = arith.mulf %13, %17 : vector<2x8x128xf32>
    %19 = arith.truncf %18 : vector<2x8x128xf32> to vector<2x8x128xbf16>
    "tpu.trace_start"() <{level = 10 : i32, message = "bts,bsd->btd"}> : () -> ()
    %cst_11 = arith.constant dense<0.000000e+00> : vector<2x8x32xf32>
    %20 = tpu.matmul %19, %1, %cst_11 {dimension_numbers = #tpu.dot_dimension_numbers<[2], [1], [1], [2], [0, 0, 0, 1, 1, 2], [0], [0]>} : vector<2x8x128xbf16>, vector<2x128x32xbf16>, vector<2x8x32xf32> -> vector<2x8x32xf32>
    "tpu.trace_stop"() : () -> ()
    %c0_12 = arith.constant 0 : index
    %c0_13 = arith.constant 0 : index
    %21 = vector.load %arg5[%c0_12, %c0_13] : memref<32x32xbf16, #tpu.memory_space<vmem>>, vector<32x32xbf16>
    %22 = vector.shape_cast %21 : vector<32x32xbf16> to vector<1x32x32xbf16>
    %23 = vector.broadcast %22 : vector<1x32x32xbf16> to vector<2x32x32xbf16>
    %c0_14 = arith.constant 0 : index
    %c0_15 = arith.constant 0 : index
    %24 = vector.load %arg6[%c0_14, %c0_15] : memref<32x32xbf16, #tpu.memory_space<vmem>>, vector<32x32xbf16>
    %25 = vector.shape_cast %24 : vector<32x32xbf16> to vector<1x32x32xbf16>
    %26 = vector.broadcast %25 : vector<1x32x32xbf16> to vector<2x32x32xbf16>
    %27 = arith.truncf %20 : vector<2x8x32xf32> to vector<2x8x32xbf16>
    "tpu.trace_start"() <{level = 10 : i32, message = "btd,bde->bte"}> : () -> ()
    %cst_16 = arith.constant dense<0.000000e+00> : vector<2x8x32xf32>
    %28 = tpu.matmul %27, %23, %cst_16 {dimension_numbers = #tpu.dot_dimension_numbers<[2], [1], [1], [2], [0, 0, 0, 1, 1, 2], [0], [0]>} : vector<2x8x32xbf16>, vector<2x32x32xbf16>, vector<2x8x32xf32> -> vector<2x8x32xf32>
    %cst_17 = arith.constant dense<0.000000e+00> : vector<2x8x32xf32>
    %29 = tpu.matmul %0, %26, %cst_17 {dimension_numbers = #tpu.dot_dimension_numbers<[2], [1], [1], [2], [0, 0, 0, 1, 1, 2], [0], [0]>} : vector<2x8x32xbf16>, vector<2x32x32xbf16>, vector<2x8x32xf32> -> vector<2x8x32xf32>
    "tpu.trace_stop"() : () -> ()
    %30 = arith.addf %28, %29 : vector<2x8x32xf32>
    %31 = math.tanh %30 : vector<2x8x32xf32>
    %32 = arith.truncf %31 : vector<2x8x32xf32> to vector<2x8x32xbf16>
    %c0_18 = arith.constant 0 : index
    %c0_19 = arith.constant 0 : index
    %c0_20 = arith.constant 0 : index
    %33 = vector.load %arg7[%c0_18, %c0_19, %c0_20] : memref<2x8x32xbf16, #tpu.memory_space<vmem>>, vector<2x8x32xbf16>
    tpu.vector_store %arg7[%c0_18, %c0_19, %c0_20], %32 {strides = array<i32>} : memref<2x8x32xbf16, #tpu.memory_space<vmem>>, vector<2x8x32xbf16>,
    %c0_21 = arith.constant 0 : index
    %c0_22 = arith.constant 0 : index
    %c0_23 = arith.constant 0 : index
    %34 = vector.load %arg8[%c0_21, %c0_22, %c0_23] : memref<2x8x128xf32, #tpu.memory_space<vmem>>, vector<2x8x128xf32>
    tpu.vector_store %arg8[%c0_21, %c0_22, %c0_23], %18 {strides = array<i32>} : memref<2x8x128xf32, #tpu.memory_space<vmem>>, vector<2x8x128xf32>,
    return
  }
  func.func @transform_0(%arg0: i32, %arg1: i32) -> (i32, i32, i32) {
    %c0_i32 = arith.constant 0 : i32
    %c0_i32_0 = arith.constant 0 : i32
    %c0_i32_1 = arith.constant 0 : i32
    return %arg0, %c0_i32, %c0_i32_0 : i32, i32, i32
  }
  func.func @transform_1(%arg0: i32, %arg1: i32) -> (i32, i32, i32) {
    %c0_i32 = arith.constant 0 : i32
    %c0_i32_0 = arith.constant 0 : i32
    return %arg0, %arg1, %c0_i32 : i32, i32, i32
  }
  func.func @transform_2(%arg0: i32, %arg1: i32) -> (i32, i32, i32) {
    %c0_i32 = arith.constant 0 : i32
    %c0_i32_0 = arith.constant 0 : i32
    %c0_i32_1 = arith.constant 0 : i32
    return %arg0, %c0_i32, %c0_i32_0 : i32, i32, i32
  }
  func.func @transform_3(%arg0: i32, %arg1: i32) -> (i32, i32) {
    %c0_i32 = arith.constant 0 : i32
    %c0_i32_0 = arith.constant 0 : i32
    %c0_i32_1 = arith.constant 0 : i32
    return %c0_i32, %c0_i32_0 : i32, i32
  }
  func.func @transform_4(%arg0: i32, %arg1: i32) -> (i32, i32) {
    %c0_i32 = arith.constant 0 : i32
    %c0_i32_0 = arith.constant 0 : i32
    %c0_i32_1 = arith.constant 0 : i32
    return %c0_i32, %c0_i32_0 : i32, i32
  }
  func.func @transform_5(%arg0: i32, %arg1: i32) -> (i32, i32, i32) {
    %c0_i32 = arith.constant 0 : i32
    %c0_i32_0 = arith.constant 0 : i32
    return %arg0, %arg1, %c0_i32 : i32, i32, i32
  }
  func.func @transform_6(%arg0: i32, %arg1: i32) -> (i32, i32, i32) {
    %c0_i32 = arith.constant 0 : i32
    %c0_i32_0 = arith.constant 0 : i32
    return %arg0, %arg1, %c0_i32 : i32, i32, i32
  }
}

</mosaic_0001>

<bundles_post_ra>
// kernel: tpu_custom_call.1
= control target key start
LH: loop header
LB: loop body
LE: loop exit
PB: predicated region body
PF: predicated region fallthrough
CT: control target
= control target key end

     0   :  { %12 = vsyncpa [#allocation3], 0  ;;  %v939_v1 = vmov 0.0   ;;  %vm99_vm0 = vcmask 261120   ;;  %vm940_vm1 = vmmov 0   ;;  %v941_v15 = vmov 0   ;;  %s1193_s0 = inlined_call_operand.vmem [shape: s32[2,1,1], index: 0, kind: input, shape index: {}]   ;;  %s1194_s1 = inlined_call_operand.vmem [shape: bf16[2,8,32], index: 1, kind: input, shape index: {}]   ;;  %s1195_s2 = inlined_call_operand.vmem [shape: bf16[2,128,32], index: 2, kind: input, shape index: {}]   ;;  %s1196_s3 = inlined_call_operand.vmem [shape: bf16[32,32], index: 3, kind: input, shape index: {}]   ;;  %s1197_s4 = inlined_call_operand.vmem [shape: bf16[32,32], index: 4, kind: input, shape index: {}]   ;;  %s1198_s5 = inlined_call_operand.hbm [shape: bf16[2,8,32], index: 5, kind: output, shape index: {0}]   ;;  %s1199_s6 = inlined_call_operand.hbm [shape: f32[2,8,128], index: 6, kind: output, shape index: {1}]  }
   0x1   :  { %v986_v0 = vld [vmem:[%s1195_s2] sm:$0xff]   ;;  %729 = vmatprep.subr.bf16.mxu0 %v939_v1  ;;  %749 = vmatprep.subr.bf16.mxu1 %v939_v1  ;;  %v1003_v5 = vld [vmem:[%s1195_s2 + $0x8] sm:$0xff]   ;;  %v1019_v9 = vld [vmem:[%s1195_s2 + $0x10] sm:$0xff]  }
   0x2   :  { %v993_v2 = vld [vmem:[%s1195_s2 + $0x40] sm:$0xff]   ;;  %v104_v3 = vsel %vm99_vm0, %v986_v0, 0  ;;  %v1009_v6 = vld [vmem:[%s1195_s2 + $0x48] sm:$0xff]   ;;  %v107_v7 = vsel %vm99_vm0, %v1003_v5, 0  ;;  %v1025_v10 = vld [vmem:[%s1195_s2 + $0x50] sm:$0xff]   ;;  %v110_v11 = vsel %vm99_vm0, %v1019_v9, 0  ;;  %745 = vmatprep.mubr.msk.bf16.mxu0 %vm940_vm1, %v939_v1  ;;  %765 = vmatprep.mubr.msk.bf16.mxu1 %vm940_vm1, %v939_v1 }
   0x3   :  { %730 = vmatpush3.bf16.xpose.msra.mxu0 %v104_v3  ;;  %v211_v4 = vsel %vm99_vm0, %v993_v2, 0  ;;  %v214_v8 = vsel %vm99_vm0, %v1009_v6, 0  ;;  %v217_v12 = vsel %vm99_vm0, %v1025_v10, 0  ;;  %v671_v13 = vld [vmem:[%s1193_s0] ss:$0 sm:$0xff]  ;;  %v1041_v14 = vld [vmem:[%s1195_s2 + $0x18] sm:$0xff]   ;;  %858 = vset.pattern.permute.xlu0 %v941_v15 }
   0x4   :  { %750 = vmatpush3.bf16.xpose.msra.mxu1 %v211_v4  ;;  %731 = vmatprep.subr.bf16.mxu0 %v939_v1  ;;  %v672_v16 = vld [vmem:[%s1193_s0 + $0x1] ss:$0 sm:$0xff]  ;;  %v866_v17 = vld [vmem:[%s1195_s2 + $0x58] sm:$0xff]  }
   0x5   :  { %751 = vmatprep.subr.bf16.mxu1 %v939_v1  ;;  %287 = vperm.xlu0 %858, %v671_v13  }
   0xb   :  { %732 = vmatpush3.bf16.xpose.msra.mxu0 %v107_v7 }
   0xc   :  { %752 = vmatpush3.bf16.xpose.msra.mxu1 %v214_v8  ;;  %733 = vmatprep.subr.bf16.mxu0 %v939_v1 }
   0xd   :  { %753 = vmatprep.subr.bf16.mxu1 %v939_v1 }
  0x13   :  { %734 = vmatpush3.bf16.xpose.msra.mxu0 %v110_v11 }
  0x14   :  { %754 = vmatpush3.bf16.xpose.msra.mxu1 %v217_v12  ;;  %735 = vmatprep.subr.bf16.mxu0 %v939_v1 }
  0x15   :  { %755 = vmatprep.subr.bf16.mxu1 %v939_v1 }
  0x16   :  { %13 = vsyncpa [#allocation5], 0  ;;  %290 = vperm.xlu0 %858, %v672_v16   ;;  %v113_v18 = vsel %vm99_vm0, %v1041_v14, 0  ;;  %v220_v19 = vsel %vm99_vm0, %v866_v17, 0  ;;  %v867_v20 = vld [vmem:[%s1195_s2 + $0x20] sm:$0xff]   ;;  %v869_v24 = vld [vmem:[%s1195_s2 + $0x28] sm:$0xff]   ;;  %v276_v38 = vlaneseq }
  0x17   :  { %v868_v21 = vld [vmem:[%s1195_s2 + $0x60] sm:$0xff]   ;;  %v116_v22 = vsel %vm99_vm0, %v867_v20, 0  ;;  %v870_v25 = vld [vmem:[%s1195_s2 + $0x68] sm:$0xff]   ;;  %v119_v26 = vsel %vm99_vm0, %v869_v24, 0  ;;  %v871_v28 = vld [vmem:[%s1195_s2 + $0x30] sm:$0xff]   ;;  %s942_s0 = smov [#allocation4]  }
  0x18   :  { %v223_v23 = vsel %vm99_vm0, %v868_v21, 0  ;;  %v226_v27 = vsel %vm99_vm0, %v870_v25, 0  ;;  %v872_v29 = vld [vmem:[%s1195_s2 + $0x70] sm:$0xff]   ;;  %v122_v30 = vsel %vm99_vm0, %v871_v28, 0  ;;  %v873_v32 = vld [vmem:[%s1195_s2 + $0x38] sm:$0xff]   ;;  %v277_v40 = vand.u32 127, %v276_v38 }
  0x19   :  { %v229_v31 = vsel %vm99_vm0, %v872_v29, 0  ;;  %v874_v33 = vld [vmem:[%s1195_s2 + $0x78] sm:$0xff]   ;;  %v125_v34 = vsel %vm99_vm0, %v873_v32, 0  ;;  %v1099_v36 = vld [vmem:[%s1194_s1] sm:$0xf]  ;;  %v878_v8 = vld [vmem:[%s1196_s3 + $0x8] sm:$0xff]  }
  0x1a   :  { %v232_v35 = vsel %vm99_vm0, %v874_v33, 0  ;;  %v1104_v37 = vld [vmem:[%s1194_s1 + $0x4] sm:$0xf]  ;;  %s638_s17 = sshll.u32 %s942_s0, 4  ;;  %s639_s17 = int_to_ptr.vmem [resolvable:$true] %s638_s17 }
  0x1b   :  { %736 = vmatpush3.bf16.xpose.msra.mxu0 %v113_v18  ;;  %v877_v7 = vld [vmem:[%s1196_s3] sm:$0xff]   ;;  %s891_s3 = scalar_lea.vmem %s639_s17, 256  ;;  %p896_p1 = scmp.lt.s32.totalorder %s639_s17, %s639_s17 }
  0x1c   :  { %756 = vmatpush3.bf16.xpose.msra.mxu1 %v220_v19  ;;  %737 = vmatprep.subr.bf16.mxu0 %v939_v1  ;;  %p892_p0 = scmp.ne.s32.totalorder %s639_s17, %s891_s3  ;;  %p897_p2 = scmp.lt.s32.totalorder %s891_s3, %s891_s3 }
  0x1d   :  { %757 = vmatprep.subr.bf16.mxu1 %v939_v1 }
  0x1e   :  { %p898_p3 = por %p897_p2, %p896_p1 }
  0x20   :  { %p899_p4 = pnand %p898_p3, %p892_p0 }
  0x23   :  { %738 = vmatpush3.bf16.xpose.msra.mxu0 %v116_v22 }
  0x24   :  { %758 = vmatpush3.bf16.xpose.msra.mxu1 %v223_v23  ;;  %739 = vmatprep.subr.bf16.mxu0 %v939_v1 }
  0x25   :  { %759 = vmatprep.subr.bf16.mxu1 %v939_v1 }
  0x2b   :  { %740 = vmatpush3.bf16.xpose.msra.mxu0 %v119_v26 }
  0x2c   :  { %760 = vmatpush3.bf16.xpose.msra.mxu1 %v226_v27  ;;  %741 = vmatprep.subr.bf16.mxu0 %v939_v1 }
  0x2d   :  { %761 = vmatprep.subr.bf16.mxu1 %v939_v1 }
  0x33   :  { %742 = vmatpush3.bf16.xpose.msra.mxu0 %v122_v30 }
  0x34   :  { %762 = vmatpush3.bf16.xpose.msra.mxu1 %v229_v31  ;;  %743 = vmatprep.subr.bf16.mxu0 %v939_v1 }
  0x35   :  { %763 = vmatprep.subr.bf16.mxu1 %v939_v1 }
  0x3b   :  { %744 = vmatpush3.bf16.xpose.msra.mxu0 %v125_v34 }
  0x3c   :  { %764 = vmatpush3.bf16.xpose.msra.mxu1 %v232_v35  ;;  %769 = vmatprep.subr.bf16.mxu0 %v939_v1 }
  0x3d   :  { %789 = vmatprep.subr.bf16.mxu1 %v939_v1 }
  0x42   :  { %746 = vmatmul.mubr.msk.bf16.vlgmr.msra.gmra.mrb[0].mxu0 %vm99_vm0, %v1099_v36 }
  0x43   :  { %766 = vmatmul.mubr.msk.bf16.vlgmr.msra.gmra.mrb[0].mxu1 %vm99_vm0, %v1104_v37  ;;  %770 = vmatpush3.bf16.msra.mxu0 %v986_v0  ;;  %v875_v0 = vld [vmem:[%s1197_s4] sm:$0xff]  }
  0x44   :  { %771 = vmatprep.subr.bf16.mxu0 %v939_v1  ;;  %790 = vmatpush3.bf16.msra.mxu1 %v993_v2 }
  0x45   :  { %791 = vmatprep.subr.bf16.mxu1 %v939_v1  ;;  %785 = vmatprep.mubr.msk.bf16.mxu0 %vm940_vm1, %v939_v1 }
  0x46   :  { %805 = vmatprep.mubr.msk.bf16.mxu1 %vm940_vm1, %v939_v1 }
  0x47   :  { %772 = vmatpush3.bf16.msra.mxu0 %v1003_v5  ;;  %v876_v5 = vld [vmem:[%s1197_s4 + $0x8] sm:$0xff]  }
  0x48   :  { %773 = vmatprep.subr.bf16.mxu0 %v939_v1  ;;  %792 = vmatpush3.bf16.msra.mxu1 %v1009_v6 }
  0x49   :  { %793 = vmatprep.subr.bf16.mxu1 %v939_v1 }
  0x4b   :  { %774 = vmatpush3.bf16.msra.mxu0 %v1019_v9 }
  0x4c   :  { %775 = vmatprep.subr.bf16.mxu0 %v939_v1  ;;  %794 = vmatpush3.bf16.msra.mxu1 %v1025_v10 }
  0x4d   :  { %795 = vmatprep.subr.bf16.mxu1 %v939_v1 }
  0x4f   :  { %776 = vmatpush3.bf16.msra.mxu0 %v1041_v14 }
  0x50   :  { %777 = vmatprep.subr.bf16.mxu0 %v939_v1  ;;  %796 = vmatpush3.bf16.msra.mxu1 %v866_v17 }
  0x51   :  { %797 = vmatprep.subr.bf16.mxu1 %v939_v1 }
  0x53   :  { %778 = vmatpush3.bf16.msra.mxu0 %v867_v20 }
  0x54   :  { %779 = vmatprep.subr.bf16.mxu0 %v939_v1  ;;  %798 = vmatpush3.bf16.msra.mxu1 %v868_v21 }
  0x55   :  { %799 = vmatprep.subr.bf16.mxu1 %v939_v1 }
  0x57   :  { %780 = vmatpush3.bf16.msra.mxu0 %v869_v24 }
  0x58   :  { %781 = vmatprep.subr.bf16.mxu0 %v939_v1  ;;  %800 = vmatpush3.bf16.msra.mxu1 %v870_v25 }
  0x59   :  { %801 = vmatprep.subr.bf16.mxu1 %v939_v1 }
  0x5b   :  { %782 = vmatpush3.bf16.msra.mxu0 %v871_v28 }
  0x5c   :  { %783 = vmatprep.subr.bf16.mxu0 %v939_v1  ;;  %802 = vmatpush3.bf16.msra.mxu1 %v872_v29 }
  0x5d   :  { %803 = vmatprep.subr.bf16.mxu1 %v939_v1 }
  0x5f   :  { %784 = vmatpush3.bf16.msra.mxu0 %v873_v32 }
  0x60   :  { %804 = vmatpush3.bf16.msra.mxu1 %v874_v33  ;;  %809 = vmatprep.subr.bf16.mxu0 %v939_v1 }
  0x61   :  { %817 = vmatprep.subr.bf16.mxu1 %v939_v1 }
  0x84   :  { %v288_v39 = vpop.permute.xlu0 %287 }
  0x85   :  { %vm292_vm2 = vcmp.lt.s32.totalorder %v277_v40, %v288_v39 }
  0x95   :  { %v291_v41 = vpop.permute.xlu0 %290 }
  0x96   :  { %vm293_vm3 = vcmp.lt.s32.totalorder %v277_v40, %v291_v41 }
 0x115   :  { %v161_v42 = vpop.f32.mrb[0].mxu0 }
 0x116   :  { %v268_v43 = vpop.f32.mrb[0].mxu1  ;;  %v747_v44 = vpop.f32.mrb[1].mxu0  ;;  %v294_v45 = vsel %vm292_vm2, %v161_v42, -3.4028235e+38 }
 0x117   :  { %v767_v46 = vpop.f32.mrb[1].mxu1  ;;  %296 = vmax.xlane.f32.xlu1 %v294_v45  ;;  %v164_v47 = vpop.f32.mrb[2].mxu0  ;;  %v295_v51 = vsel %vm293_vm3, %v268_v43, -3.4028235e+38 }
 0x118   :  { %v748_v48 = vpop.f32.mrb[3].mxu0  ;;  %v271_v49 = vpop.f32.mrb[2].mxu1 }
 0x119   :  { %v768_v50 = vpop.f32.mrb[3].mxu1 }
 0x11b   :  { %298 = vmax.xlane.f32.xlu1 %v295_v51 }
 0x1a4   :  { %v297_v52 = vpop.xlane.xlu1 %296 }
 0x1a5   :  { %v300_v53 = vsub.f32 %v294_v45, %v297_v52 }
 0x1a7   :  { %v302_v54 = vmul.f32 1.442695, %v300_v53 }
 0x1a8   :  { %v299_v55 = vpop.xlane.xlu1 %298 }
 0x1a9   :  { %879 = vpow2.f32 %v302_v54  ;;  %v301_v56 = vsub.f32 %v295_v51, %v299_v55 }
 0x1ab   :  { %v304_v57 = vmul.f32 1.442695, %v301_v56 }
 0x1ad   :  { %881 = vpow2.f32 %v304_v57 }
 0x1b3   :  { %v880_v58 = vpop.eup %879 }
 0x1b4   :  { %306 = vadd.xlane.f32.xlu0 %v880_v58 }
 0x1b7   :  { %v882_v59 = vpop.eup %881 }
 0x1b8   :  { %308 = vadd.xlane.f32.xlu1 %v882_v59 }
 0x241   :  { %v307_v60 = vpop.xlane.xlu0 %306 }
 0x242   :  { %883 = vrcp.f32 %v307_v60 }
 0x245   :  { %v309_v61 = vpop.xlane.xlu1 %308 }
 0x246   :  { %885 = vrcp.f32 %v309_v61 }
 0x24c   :  { %v884_v62 = vpop.eup %883 }
 0x24d   :  { %v312_v63 = vmul.f32 %v884_v62, %v880_v58 }
 0x24f   :  { %v314_v2 = vpack.c.bf16 %v312_v63, %v312_v63  ;;  %619 = vst [vmem:[#allocation4] sm:$0xff] %v312_v63 }
 0x250   :  { %v886_v3 = vpop.eup %885 }
 0x251   :  { %786 = vmatmul.mubr.bf16.vlgmr.msra.gmra.mrb[4].mxu0 %v314_v2  ;;  %v313_v4 = vmul.f32 %v886_v3, %v882_v59 }
 0x252   :  { %810 = vmatpush3.bf16.msra.mxu0 %v875_v0  ;;  %813 = vmatprep.mubr.msk.bf16.mxu0 %vm940_vm1, %v939_v1 }
 0x253   :  { %v315_v6 = vpack.c.bf16 %v313_v4, %v313_v4  ;;  %620 = vst [vmem:[#allocation4 + $0x8] sm:$0xff] %v313_v4  ;;  %811 = vmatprep.subr.bf16.mxu0 %v939_v1 }
 0x255   :  { %806 = vmatmul.mubr.bf16.vlgmr.msra.gmra.mrb[4].mxu1 %v315_v6 }
 0x256   :  { %818 = vmatpush3.bf16.msra.mxu1 %v875_v0  ;;  %812 = vmatpush3.bf16.msra.mxu0 %v876_v5 }
 0x257   :  { %819 = vmatprep.subr.bf16.mxu1 %v939_v1  ;;  %821 = vmatprep.mubr.msk.bf16.mxu1 %vm940_vm1, %v939_v1 }
 0x258   :  { %825 = vmatprep.subr.bf16.mxu0 %v939_v1 }
 0x259   :  { %814 = vmatmul.mubr.msk.bf16.vlgmr.msra.gmra.mrb[8].mxu0 %vm99_vm0, %v1099_v36 }
 0x25a   :  { %820 = vmatpush3.bf16.msra.mxu1 %v876_v5  ;;  %826 = vmatpush3.bf16.msra.mxu0 %v877_v7 }
 0x25b   :  { %833 = vmatprep.subr.bf16.mxu1 %v939_v1  ;;  %827 = vmatprep.subr.bf16.mxu0 %v939_v1 }
 0x25c   :  { %829 = vmatprep.mubr.msk.bf16.mxu0 %vm940_vm1, %v939_v1 }
 0x25d   :  { %822 = vmatmul.mubr.msk.bf16.vlgmr.msra.gmra.mrb[8].mxu1 %vm99_vm0, %v1104_v37 }
 0x25e   :  { %834 = vmatpush3.bf16.msra.mxu1 %v877_v7  ;;  %837 = vmatprep.mubr.msk.bf16.mxu1 %vm940_vm1, %v939_v1 }
 0x25f   :  { %835 = vmatprep.subr.bf16.mxu1 %v939_v1  ;;  %828 = vmatpush3.bf16.msra.mxu0 %v878_v8 }
 0x262   :  { %836 = vmatpush3.bf16.msra.mxu1 %v878_v8 }
 0x324   :  { %v358_v9 = vpop.f32.mrb[4].mxu0 }
 0x325   :  { %v420_v10 = vpack.c.bf16 %v358_v9, %v358_v9  ;;  %v787_v11 = vpop.f32.mrb[5].mxu0 }
 0x326   :  { %v361_v12 = vpop.f32.mrb[6].mxu0 }
 0x327   :  { %v788_v13 = vpop.f32.mrb[7].mxu0  ;;  %830 = vmatmul.mubr.msk.bf16.vlgmr.msra.gmra.mrb[8].mxu0 %vm99_vm0, %v420_v10 }
 0x328   :  { %v406_v14 = vpop.f32.mrb[4].mxu1 }
 0x329   :  { %v421_v15 = vpack.c.bf16 %v406_v14, %v406_v14  ;;  %v807_v16 = vpop.f32.mrb[5].mxu1 }
 0x32a   :  { %v409_v17 = vpop.f32.mrb[6].mxu1 }
 0x32b   :  { %v808_v18 = vpop.f32.mrb[7].mxu1  ;;  %838 = vmatmul.mubr.msk.bf16.vlgmr.msra.gmra.mrb[8].mxu1 %vm99_vm0, %v421_v15 }
 0x32c   :  { %902 = shalt.err (!%p899_p4)
}
 0x32d   :  { %s903_s20 = scalar_lea.hbm %s1199_s6, 256 }
 0x32e   :  { %p904_p5 = scmp.ne.s32.totalorder %s1199_s6, %s903_s20  ;;  %p907_p6 = scmp.lt.u32.totalorder %s903_s20, %s1199_s6 }
 0x330   :  { %p909_p7 = pnand %p907_p6, %p904_p5 }
 0x332   :  { %912 = shalt.err (!%p909_p7)
}
 0x333   :  { %s943_s25 = smov 128   ;;  %s944_s26 = smov 8   ;;  %vm616_vm4 = vcmask 257024  }
 0x334   :  { %644 = dma.vmem_to_hbm [thread:$0]  %s639_s17, 256, %s1199_s6, [#allocation5], %s943_s25, %s943_s25, %s944_s26  }
 0x335   :  { %s945_s29 = smov [#allocation2]  }
 0x336   :  { %s626_s30 = sshll.u32 %s945_s29, 4  ;;  %s627_s30 = int_to_ptr.vmem [resolvable:$true] %s626_s30 }
 0x337   :  { %s913_s6 = scalar_lea.vmem %s627_s30, 128  ;;  %p918_p9 = scmp.lt.s32.totalorder %s627_s30, %s627_s30 }
 0x338   :  { %p914_p8 = scmp.ne.s32.totalorder %s627_s30, %s913_s6  ;;  %p919_p10 = scmp.lt.s32.totalorder %s913_s6, %s913_s6 }
 0x33a   :  { %p920_p11 = por %p919_p10, %p918_p9 }
 0x33c   :  { %p921_p12 = pnand %p920_p11, %p914_p8 }
 0x3fa   :  { %v563_v1 = vpop.f32.mrb[8].mxu0 }
 0x3fb   :  { %887 = vtanh.f32 %v563_v1  ;;  %v831_v19 = vpop.f32.mrb[9].mxu0 }
 0x3fc   :  { %v566_v20 = vpop.f32.mrb[10].mxu0 }
 0x3fd   :  { %v832_v21 = vpop.f32.mrb[11].mxu0 }
 0x3fe   :  { %v606_v22 = vpop.f32.mrb[8].mxu1 }
 0x3ff   :  { %889 = vtanh.f32 %v606_v22  ;;  %v839_v23 = vpop.f32.mrb[9].mxu1 }
 0x400   :  { %v609_v24 = vpop.f32.mrb[10].mxu1 }
 0x401   :  { %v840_v25 = vpop.f32.mrb[11].mxu1 }
 0x405   :  { %v888_v26 = vpop.eup %887 }
 0x406   :  { %v614_v27 = vpack.c.bf16 %v888_v26, %v888_v26 }
 0x408   :  { %617 = vst.msk [vmem:[#allocation2] sm:$0xf] %vm616_vm4, %v614_v27 }
 0x409   :  { %v890_v28 = vpop.eup %889 }
 0x40a   :  { %v615_v29 = vpack.c.bf16 %v890_v28, %v890_v28 }
 0x40c   :  { %618 = vst.msk [vmem:[#allocation2 + $0x4] sm:$0xf] %vm616_vm4, %v615_v29 }
 0x40d   :  { %924 = shalt.err (!%p921_p12)
}
 0x40e   :  { %s925_s9 = scalar_lea.hbm %s1198_s5, 128 }
 0x40f   :  { %p926_p13 = scmp.ne.s32.totalorder %s1198_s5, %s925_s9  ;;  %p929_p0 = scmp.lt.u32.totalorder %s925_s9, %s1198_s5 }
 0x411   :  { %p931_p1 = pnand %p929_p0, %p926_p13 }
 0x413   :  { %934 = shalt.err (!%p931_p1)
}
 0x414   :  { %s946_s12 = smov 64   ;;  %s947_s13 = smov 4  }
 0x415   :  { %632 = dma.vmem_to_hbm [thread:$0]  %s627_s30, 128, %s1198_s5, [#allocation3], %s946_s12, %s946_s12, %s947_s13  }
 0x416   :  { %935 = dma.done.wait [#allocation3], 128  }
 0x417   :  { %936 = vsyncadd [#allocation3], 4294967168 }
 0x418   :  { %937 = dma.done.wait [#allocation5], 256  }
 0x419   :  { %938 = vsyncadd [#allocation5], 4294967040 }
 0x41a   :  { %651 = vsyncpa [#allocation3], 1 }
 0x41b   :  { %652 = vsyncpa [#allocation5], 1 }

</bundles_post_ra>
